<compile_context>
chip_gen: v7x
topology: tpu7x:2x2x1
jax: 0.10.0
libtpu: 0.0.40
codegen_flags: <defaults>
</compile_context>

<pallas_src>
import functools

import jax
import jax.numpy as jnp
from jax.experimental import pallas as pl
from jax.experimental.pallas import tpu as pltpu


_MSE_LANES = 128            # lane-dense last dim (full vreg width)
_MSE_MAX_BLOCK_ROWS = 1024  # sublane rows per block -> 1024*128*4B = 512 KiB / input
                            # (2 inputs x 2 pipeline buffers = 2 MiB: fits every chip's
                            #  scoped-VMEM default, incl. v5e 16 MiB and v7x 32 MiB)


# ---------------------------------------------------------------------------
# Kernel 1: per-block partial sums of (fixed - moved)^2.
# Block = (G, 8, 128); output block = (1, 8, 128) partial, indexed by grid step.
# Pure VPU work per step; cross-lane reduction is done once in the wrapper.
# ---------------------------------------------------------------------------
def _mse_partial_kernel(f_ref, m_ref, out_ref):
    d = f_ref[...].astype(jnp.float32) - m_ref[...].astype(jnp.float32)  # (G, 8, 128)
    out_ref[...] = jnp.sum(d * d, axis=0, keepdims=True)                 # (1, 8, 128)


def _mse_sq_sum(fixed, moved):
    """sum((fixed - moved)^2) over all elements, as f32."""
    n = fixed.size
    # Round element count up to whole (8, 128) sublane groups, then size blocks.
    rows = pl.cdiv(n, _MSE_LANES)
    rows = ((rows + 7) // 8) * 8
    block_rows = min(_MSE_MAX_BLOCK_ROWS, rows)          # multiple of 8 by construction
    nblocks = pl.cdiv(rows, block_rows)
    rows = nblocks * block_rows
    total = rows * _MSE_LANES
    g = block_rows // 8

    f = jnp.ravel(fixed)
    m = jnp.ravel(moved)
    if total != n:
        # Zero padding contributes (0 - 0)^2 = 0 to the sum -> exact.
        f = jnp.pad(f, (0, total - n))
        m = jnp.pad(m, (0, total - n))
    f3 = f.reshape(rows // 8, 8, _MSE_LANES)
    m3 = m.reshape(rows // 8, 8, _MSE_LANES)

    itemsize = jnp.dtype(fixed.dtype).itemsize
    cost = pl.CostEstimate(
        flops=3 * total,
        transcendentals=0,
        bytes_accessed=2 * total * itemsize + nblocks * 8 * _MSE_LANES * 4,
    )

    partials = pl.pallas_call(
        _mse_partial_kernel,
        out_shape=jax.ShapeDtypeStruct((nblocks, 8, _MSE_LANES), jnp.float32),
        grid_spec=pltpu.PrefetchScalarGridSpec(
            num_scalar_prefetch=0,
            grid=(nblocks,),
            in_specs=[
                pl.BlockSpec((g, 8, _MSE_LANES), lambda i: (i, 0, 0)),
                pl.BlockSpec((g, 8, _MSE_LANES), lambda i: (i, 0, 0)),
            ],
            out_specs=pl.BlockSpec((1, 8, _MSE_LANES), lambda i: (i, 0, 0)),
        ),
        compiler_params=pltpu.CompilerParams(
            dimension_semantics=("parallel",)),   # distinct output block per step
        cost_estimate=cost,
    )(f3, m3)

    # Tiny final reduction (nblocks x 8 x 128 f32) in XLA.
    return jnp.sum(partials)


# ---------------------------------------------------------------------------
# Kernel 2: accumulate sum(dy^2) and sum(dx^2) of the flow field.
# One whole batch item (C, H, W) per grid step.
# ---------------------------------------------------------------------------
def _grad_sum_kernel(fl_ref, dy_ref, dx_ref):
    @pl.when(pl.program_id(0) == 0)
    def _():
        dy_ref[...] = jnp.zeros_like(dy_ref)
        dx_ref[...] = jnp.zeros_like(dx_ref)

    v = fl_ref[0].astype(jnp.float32)          # (C, H, W)
    dy = v[:, 1:, :] - v[:, :-1, :]            # (C, H-1, W)  diff along H
    dx = v[:, :, 1:] - v[:, :, :-1]            # (C, H, W-1)  diff along W
    # Inner sum over channels is pure VPU; only the final 2D->scalar reduce hits XLU.
    dy_ref[...] += jnp.sum(jnp.sum(dy * dy, axis=0), keepdims=True)
    dx_ref[...] += jnp.sum(jnp.sum(dx * dx, axis=0), keepdims=True)


def _grad_sq_sums(flow):
    b, c, h, w = flow.shape
    itemsize = jnp.dtype(flow.dtype).itemsize
    cost = pl.CostEstimate(
        flops=6 * b * c * h * w,
        transcendentals=0,
        bytes_accessed=b * c * h * w * itemsize + 8,
    )
    dy_sum, dx_sum = pl.pallas_call(
        _grad_sum_kernel,
        out_shape=(
            jax.ShapeDtypeStruct((1, 1), jnp.float32),
            jax.ShapeDtypeStruct((1, 1), jnp.float32),
        ),
        grid_spec=pltpu.PrefetchScalarGridSpec(
            num_scalar_prefetch=0,
            grid=(b,),
            in_specs=[
                pl.BlockSpec((1, c, h, w), lambda i: (i, 0, 0, 0)),
            ],
            out_specs=[
                pl.BlockSpec((1, 1), lambda i: (0, 0)),
                pl.BlockSpec((1, 1), lambda i: (0, 0)),
            ],
        ),
        # Resident (1,1) accumulators -> this axis MUST stay "arbitrary".
        compiler_params=pltpu.CompilerParams(
            dimension_semantics=("arbitrary",)),
        cost_estimate=cost,
    )(flow)
    return dy_sum[0, 0], dx_sum[0, 0]


# ---------------------------------------------------------------------------
# MSE_SM forward: tot = mean((fixed-moved)^2) + w_sm * Grad_l2(flow)
# Grad_l2(flow) = (mean(dx^2) + mean(dy^2)) / 2   for 4D flow.
# (`weight` is accepted but unused, matching the PyTorch forward signature.)
# ---------------------------------------------------------------------------
@functools.partial(jax.jit, static_argnames=("w_sm",))
def mse_sm_forward(fixed, moved, flow, w_sm=0.1, weight=1.0):
    b, c, h, w = fixed.shape
    bf, cf, hf, wf = flow.shape

    sq_sum = _mse_sq_sum(fixed, moved)
    dy_sum, dx_sum = _grad_sq_sums(flow)

    similarity_loss = (sq_sum / (b * c * h * w)) * 1.0
    dy_mean = dy_sum / (bf * cf * (hf - 1) * wf)
    dx_mean = dx_sum / (bf * cf * hf * (wf - 1))
    smoothness_loss = ((dx_mean + dy_mean) / 2.0) * w_sm
    tot_loss = similarity_loss + smoothness_loss
    return tot_loss, similarity_loss, smoothness_loss


# pure-JAX reference (mirrors the PyTorch module exactly) for verification
def _reference(fixed, moved, flow, w_sm=0.1):
    sim = jnp.mean((fixed - moved) ** 2)
    dy = flow[:, :, 1:, :] - flow[:, :, :-1, :]
    dx = flow[:, :, :, 1:] - flow[:, :, :, :-1]
    grad = (jnp.mean(dx * dx) + jnp.mean(dy * dy)) / 2.0
    smooth = grad * w_sm
    return sim + smooth, sim, smooth


if __name__ == "__main__":
    key = jax.random.PRNGKey(0)
    k1, k2, k3 = jax.random.split(key, 3)

    # small shapes consistent with the module: images (B, C, H, W), 2D flow (B, 2, H, W)
    fixed = jax.random.normal(k1, (2, 4, 16, 16), dtype=jnp.float32)
    moved = jax.random.normal(k2, (2, 4, 16, 16), dtype=jnp.float32)
    flow = jax.random.normal(k3, (2, 2, 16, 16), dtype=jnp.float32)

    tot, sim, smooth = mse_sm_forward(fixed, moved, flow, w_sm=0.1)
    jax.block_until_ready(tot)

    # .item() in the PyTorch forward -> return host Python floats for the two components
    sim_f, smooth_f = float(sim), float(smooth)

    ref_tot, ref_sim, ref_smooth = _reference(fixed, moved, flow, w_sm=0.1)
    assert jnp.allclose(tot, ref_tot, rtol=1e-5, atol=1e-6)
    assert abs(sim_f - float(ref_sim)) < 1e-5
    assert abs(smooth_f - float(ref_smooth)) < 1e-5

    print("KERNEL_OK")
</pallas_src>

<mosaic_0001>
module attributes {stable_mosaic.version = 11 : i64} {
  func.func @_mse_partial_kernel(%arg0: i32, %arg1: memref<2x8x128xf32, #tpu.memory_space<vmem>>, %arg2: memref<2x8x128xf32, #tpu.memory_space<vmem>>, %arg3: memref<1x8x128xf32, #tpu.memory_space<vmem>>) attributes {dimension_semantics = [#tpu.dimension_semantics<parallel>], iteration_bounds = array<i64: 1>, scalar_prefetch = 0 : i64, scratch_operands = 0 : i64, tpu.core_type = #tpu.core_type<tc>, window_params = [{transform_indices = @transform_0, window_bounds = array<i64: 2, 8, 128>}, {transform_indices = @transform_1, window_bounds = array<i64: 2, 8, 128>}, {transform_indices = @transform_2, window_bounds = array<i64: 1, 8, 128>}]} {
    %c0 = arith.constant 0 : index
    %c0_0 = arith.constant 0 : index
    %c0_1 = arith.constant 0 : index
    %0 = vector.load %arg1[%c0, %c0_0, %c0_1] : memref<2x8x128xf32, #tpu.memory_space<vmem>>, vector<2x8x128xf32>
    %c0_2 = arith.constant 0 : index
    %c0_3 = arith.constant 0 : index
    %c0_4 = arith.constant 0 : index
    %1 = vector.load %arg2[%c0_2, %c0_3, %c0_4] : memref<2x8x128xf32, #tpu.memory_space<vmem>>, vector<2x8x128xf32>
    %2 = arith.subf %0, %1 : vector<2x8x128xf32>
    %3 = arith.mulf %2, %2 : vector<2x8x128xf32>
    %cst = arith.constant dense<0.000000e+00> : vector<8x128xf32>
    %4 = vector.multi_reduction <add>, %3, %cst [0] : vector<2x8x128xf32> to vector<8x128xf32>
    %5 = vector.shape_cast %4 : vector<8x128xf32> to vector<1x8x128xf32>
    %c0_5 = arith.constant 0 : index
    %c0_6 = arith.constant 0 : index
    %c0_7 = arith.constant 0 : index
    %6 = vector.load %arg3[%c0_5, %c0_6, %c0_7] : memref<1x8x128xf32, #tpu.memory_space<vmem>>, vector<1x8x128xf32>
    tpu.vector_store %arg3[%c0_5, %c0_6, %c0_7], %5 {strides = array<i32>} : memref<1x8x128xf32, #tpu.memory_space<vmem>>, vector<1x8x128xf32>,
    return
  }
  func.func @transform_0(%arg0: i32) -> (i32, i32, i32) {
    %c0_i32 = arith.constant 0 : i32
    %c0_i32_0 = arith.constant 0 : i32
    %c0_i32_1 = arith.constant 0 : i32
    return %arg0, %c0_i32, %c0_i32_0 : i32, i32, i32
  }
  func.func @transform_1(%arg0: i32) -> (i32, i32, i32) {
    %c0_i32 = arith.constant 0 : i32
    %c0_i32_0 = arith.constant 0 : i32
    %c0_i32_1 = arith.constant 0 : i32
    return %arg0, %c0_i32, %c0_i32_0 : i32, i32, i32
  }
  func.func @transform_2(%arg0: i32) -> (i32, i32, i32) {
    %c0_i32 = arith.constant 0 : i32
    %c0_i32_0 = arith.constant 0 : i32
    %c0_i32_1 = arith.constant 0 : i32
    return %arg0, %c0_i32, %c0_i32_0 : i32, i32, i32
  }
}

module attributes {stable_mosaic.version = 11 : i64} {
  func.func @_grad_sum_kernel(%arg0: i32, %arg1: memref<1x2x16x16xf32, #tpu.memory_space<vmem>>, %arg2: memref<1x1xf32, #tpu.memory_space<vmem>>, %arg3: memref<1x1xf32, #tpu.memory_space<vmem>>) attributes {dimension_semantics = [#tpu.dimension_semantics<arbitrary>], iteration_bounds = array<i64: 2>, scalar_prefetch = 0 : i64, scratch_operands = 0 : i64, tpu.core_type = #tpu.core_type<tc>, window_params = [{transform_indices = @transform_0, window_bounds = array<i64: 1, 2, 16, 16>}, {pipeline_mode = #tpu.pipeline_mode<synchronous>, transform_indices = @transform_1, window_bounds = array<i64: 1, 1>}, {pipeline_mode = #tpu.pipeline_mode<synchronous>, transform_indices = @transform_2, window_bounds = array<i64: 1, 1>}]} {
    %c0_i32 = arith.constant 0 : i32
    %0 = arith.cmpi eq, %arg0, %c0_i32 : i32
    %1 = arith.extui %0 : i1 to i32
    %c0_i32_0 = arith.constant 0 : i32
    %2 = arith.cmpi ne, %1, %c0_i32_0 : i32
    scf.if %2 {
      %cst_15 = arith.constant 0.000000e+00 : f32
      %31 = vector.broadcast %cst_15 : f32 to vector<1x1xf32>
      %c0_16 = arith.constant 0 : index
      %c0_17 = arith.constant 0 : index
      %32 = vector.load %arg2[%c0_16, %c0_17] : memref<1x1xf32, #tpu.memory_space<vmem>>, vector<1x1xf32>
      tpu.vector_store %arg2[%c0_16, %c0_17], %31 {strides = array<i32>} : memref<1x1xf32, #tpu.memory_space<vmem>>, vector<1x1xf32>,
      %cst_18 = arith.constant 0.000000e+00 : f32
      %33 = vector.broadcast %cst_18 : f32 to vector<1x1xf32>
      %c0_19 = arith.constant 0 : index
      %c0_20 = arith.constant 0 : index
      %34 = vector.load %arg3[%c0_19, %c0_20] : memref<1x1xf32, #tpu.memory_space<vmem>>, vector<1x1xf32>
      tpu.vector_store %arg3[%c0_19, %c0_20], %33 {strides = array<i32>} : memref<1x1xf32, #tpu.memory_space<vmem>>, vector<1x1xf32>,
    } else {
    }
    %c0 = arith.constant 0 : index
    %c0_1 = arith.constant 0 : index
    %c0_2 = arith.constant 0 : index
    %c0_3 = arith.constant 0 : index
    %3 = vector.load %arg1[%c0, %c0_1, %c0_2, %c0_3] : memref<1x2x16x16xf32, #tpu.memory_space<vmem>>, vector<1x2x16x16xf32>
    %4 = vector.shape_cast %3 : vector<1x2x16x16xf32> to vector<2x16x16xf32>
    %5 = vector.extract_strided_slice %4 {offsets = [0, 1, 0], sizes = [2, 15, 16], strides = [1, 1, 1]} : vector<2x16x16xf32> to vector<2x15x16xf32>
    %6 = vector.extract_strided_slice %4 {offsets = [0, 0, 0], sizes = [2, 15, 16], strides = [1, 1, 1]} : vector<2x16x16xf32> to vector<2x15x16xf32>
    %7 = arith.subf %5, %6 : vector<2x15x16xf32>
    %8 = vector.extract_strided_slice %4 {offsets = [0, 0, 1], sizes = [2, 16, 15], strides = [1, 1, 1]} : vector<2x16x16xf32> to vector<2x16x15xf32>
    %9 = vector.extract_strided_slice %4 {offsets = [0, 0, 0], sizes = [2, 16, 15], strides = [1, 1, 1]} : vector<2x16x16xf32> to vector<2x16x15xf32>
    %10 = arith.subf %8, %9 : vector<2x16x15xf32>
    %c0_4 = arith.constant 0 : index
    %c0_5 = arith.constant 0 : index
    %11 = vector.load %arg2[%c0_4, %c0_5] : memref<1x1xf32, #tpu.memory_space<vmem>>, vector<1x1xf32>
    %12 = arith.mulf %7, %7 : vector<2x15x16xf32>
    %cst = arith.constant dense<0.000000e+00> : vector<15x16xf32>
    %13 = vector.multi_reduction <add>, %12, %cst [0] : vector<2x15x16xf32> to vector<15x16xf32>
    %14 = vector.shape_cast %13 : vector<15x16xf32> to vector<1x15x16xf32>
    %cst_6 = arith.constant dense<0.000000e+00> : vector<1xf32>
    %15 = vector.multi_reduction <add>, %14, %cst_6 [1, 2] : vector<1x15x16xf32> to vector<1xf32>
    %16 = vector.shape_cast %15 : vector<1xf32> to vector<1x1x1xf32>
    %17 = vector.extract %16[0, 0, 0] : f32 from vector<1x1x1xf32>
    %18 = vector.broadcast %17 : f32 to vector<1x1xf32>
    %19 = arith.addf %11, %18 : vector<1x1xf32>
    %c0_7 = arith.constant 0 : index
    %c0_8 = arith.constant 0 : index
    %20 = vector.load %arg2[%c0_7, %c0_8] : memref<1x1xf32, #tpu.memory_space<vmem>>, vector<1x1xf32>
    tpu.vector_store %arg2[%c0_7, %c0_8], %19 {strides = array<i32>} : memref<1x1xf32, #tpu.memory_space<vmem>>, vector<1x1xf32>,
    %c0_9 = arith.constant 0 : index
    %c0_10 = arith.constant 0 : index
    %21 = vector.load %arg3[%c0_9, %c0_10] : memref<1x1xf32, #tpu.memory_space<vmem>>, vector<1x1xf32>
    %22 = arith.mulf %10, %10 : vector<2x16x15xf32>
    %cst_11 = arith.constant dense<0.000000e+00> : vector<16x15xf32>
    %23 = vector.multi_reduction <add>, %22, %cst_11 [0] : vector<2x16x15xf32> to vector<16x15xf32>
    %24 = vector.shape_cast %23 : vector<16x15xf32> to vector<1x16x15xf32>
    %cst_12 = arith.constant dense<0.000000e+00> : vector<1xf32>
    %25 = vector.multi_reduction <add>, %24, %cst_12 [1, 2] : vector<1x16x15xf32> to vector<1xf32>
    %26 = vector.shape_cast %25 : vector<1xf32> to vector<1x1x1xf32>
    %27 = vector.extract %26[0, 0, 0] : f32 from vector<1x1x1xf32>
    %28 = vector.broadcast %27 : f32 to vector<1x1xf32>
    %29 = arith.addf %21, %28 : vector<1x1xf32>
    %c0_13 = arith.constant 0 : index
    %c0_14 = arith.constant 0 : index
    %30 = vector.load %arg3[%c0_13, %c0_14] : memref<1x1xf32, #tpu.memory_space<vmem>>, vector<1x1xf32>
    tpu.vector_store %arg3[%c0_13, %c0_14], %29 {strides = array<i32>} : memref<1x1xf32, #tpu.memory_space<vmem>>, vector<1x1xf32>,
    return
  }
  func.func @transform_0(%arg0: i32) -> (i32, i32, i32, i32) {
    %c0_i32 = arith.constant 0 : i32
    %c0_i32_0 = arith.constant 0 : i32
    %c0_i32_1 = arith.constant 0 : i32
    %c0_i32_2 = arith.constant 0 : i32
    return %arg0, %c0_i32, %c0_i32_0, %c0_i32_1 : i32, i32, i32, i32
  }
  func.func @transform_1(%arg0: i32) -> (i32, i32) {
    %c0_i32 = arith.constant 0 : i32
    %c0_i32_0 = arith.constant 0 : i32
    %c0_i32_1 = arith.constant 0 : i32
    return %c0_i32, %c0_i32_0 : i32, i32
  }
  func.func @transform_2(%arg0: i32) -> (i32, i32) {
    %c0_i32 = arith.constant 0 : i32
    %c0_i32_0 = arith.constant 0 : i32
    %c0_i32_1 = arith.constant 0 : i32
    return %c0_i32, %c0_i32_0 : i32, i32
  }
}

</mosaic_0001>

<bundles_post_ra>
// kernel: mse_sm_forward.2
= control target key start
LH: loop header
LB: loop body
LE: loop exit
PB: predicated region body
PF: predicated region fallthrough
CT: control target
= control target key end

     0   :  { %s55_s0 = inlined_call_operand.vmem [shape: f32[2,8,128], index: 0, kind: input, shape index: {}]   ;;  %s56_s1 = inlined_call_operand.vmem [shape: f32[2,8,128], index: 1, kind: input, shape index: {}]   ;;  %s57_s2 = inlined_call_operand.vmem [shape: f32[1,8,128], index: 2, kind: output, shape index: {}]  }
   0x1   :  { %v11_v0 = vld [vmem:[%s55_s0] sm:$0xff]  ;;  %v12_v1 = vld [vmem:[%s55_s0 + $0x8] sm:$0xff] }
   0x2   :  { %v13_v2 = vld [vmem:[%s56_s1] sm:$0xff]  ;;  %v14_v3 = vld [vmem:[%s56_s1 + $0x8] sm:$0xff] }
   0x3   :  { %v15_v4 = vsub.f32 %v11_v0, %v13_v2  ;;  %v16_v5 = vsub.f32 %v12_v1, %v14_v3 }
   0x5   :  { %v17_v6 = vmul.f32 %v15_v4, %v15_v4  ;;  %v18_v7 = vmul.f32 %v16_v5, %v16_v5 }
   0x7   :  { %v19_v8 = vadd.f32 %v18_v7, %v17_v6 }
   0x9   :  { %20 = vst [vmem:[%s57_s2] sm:$0xff] %v19_v8 }

// kernel: mse_sm_forward.3
= control target key start
LH: loop header
LB: loop body
LE: loop exit
PB: predicated region body
PF: predicated region fallthrough
CT: control target
= control target key end

     0   :  { %8 = vsyncpa [#allocation3], 0  ;;  %s518_s0 = inlined_call_operand.vmem [shape: f32[2,2,16,16], index: 0, kind: input, shape index: {}]   ;;  %s519_s1 = inlined_call_operand.hbm [shape: f32[1,1], index: 1, kind: output, shape index: {0}]   ;;  %s520_s2 = inlined_call_operand.hbm [shape: f32[1,1], index: 2, kind: output, shape index: {1}]  }
   0x1   :  { %9 = vsyncpa [#allocation5], 0  ;;  %s448_s9 = smov 0  }
   0x2 LB: > { %s454_s10 = sadd.s32 4294967295, %s426_s9   ;;  %p320_p0 = scmp.ge.s32.totalorder %s426_s9, 1  ;;  %s426_s9 = sphi %s448_s9, %s15_s9  }
   0x3   : > { %p107_p1 = scmp.lt.s32.totalorder %s426_s9, 3 }
   0x5   : > { %p108_p2 = pnand %p320_p0, %p107_p1 }
   0x6   : > { %p124_p3 = scmp.lt.s32.totalorder (!%p108_p2), %s454_s10, 1  ;;  %p323_p4 = scmp.ne.s32.totalorder (!%p108_p2), %s454_s10, 0 }
   0x7   : > { %111 = sbr.rel (%p108_p2) target bundleno = 491 (0x1eb), region = 24 }
   0xe   : > { %s125_s11 = scalar_select %p124_p3, %s454_s10, 1 }
   0xf   : > { %132 = sbr.rel (%p323_p4) target bundleno = 22 (0x16), region = 28  ;;  %vm133_vm0 = vcmask (!%p323_p4), 0   ;;  %v428_v0 = vmov (!%p323_p4), 0.0  }
  0x10   : > { %s330_s12 = sshll.u32 %s125_s11, 5  ;;  %134 = vst.msk [vmem:[#allocation2] sm:$0x1] (!%p323_p4), %vm133_vm0, %v428_v0  ;;  %135 = vst.msk [vmem:[#allocation4] sm:$0x1] (!%p323_p4), %vm133_vm0, %v428_v0 }
  0x11   : > { %s128_s15 = scalar_lea.vmem %s518_s0, %s330_s12 }
  0x16 PF: > { %v138_v1 = vld [vmem:[%s128_s15 + $0x10] sm:$0xff]  ;;  %v136_v2 = vld [vmem:[%s128_s15] sm:$0xff]  ;;  %s429_s16 = smov 1   ;;  %v139_v3 = vld [vmem:[%s128_s15 + $0x18] sm:$0xff]  ;;  %vm218_vm1 = vcmask 130056   ;;  %vm144_vm2 = vcmask 1040384  }
  0x17   : > { %163 = vrot.lane.b32.xlu1 %v138_v1, %s429_s16  ;;  %159 = vrot.lane.b32.xlu0 %v136_v2, %s429_s16  ;;  %v137_v4 = vld [vmem:[%s128_s15 + $0x8] sm:$0xff]  ;;  %v148_v9 = vrot.slane %v138_v1, 7  ;;  %v145_v10 = vrot.slane %v136_v2, 7  ;;  %v149_v11 = vrot.slane %v139_v3, 7  ;;  %s430_s17 = smov 127   ;;  %vm180_vm3 = vcmask 130049  }
  0x18   : > { %v146_v12 = vrot.slane %v137_v4, 7  ;;  %vm184_vm4 = vcmask 130048   ;;  %vm190_vm5 = vcmask 1046528   ;;  %vm197_vm6 = vcmask 129024   ;;  %v175_v61 = vld [vmem:[#allocation2] sm:$0x1] }
  0x19   : > { %v150_v22 = vsel %vm144_vm2, %v148_v9, %v149_v11  ;;  %v157_v26 = vsub.f32 %v138_v1, %v148_v9  ;;  %v155_v29 = vsub.f32 %v136_v2, %v145_v10  ;;  %vm233_vm7 = vcmask 121856   ;;  %s431_s18 = smov [#allocation2]   ;;  %p343_p5 = scmp.eq.s32.totalorder %s454_s10, 1 }
  0x1a   : > { %v147_v23 = vsel %vm144_vm2, %v145_v10, %v146_v12  ;;  %v158_v30 = vsub.f32 %v139_v3, %v150_v22  ;;  %s256_s19 = sshll.u32 %s431_s18, 4  ;;  %vm211_vm8 = vcmask 0   ;;  %s257_s19 = int_to_ptr.vmem [resolvable:$true] %s256_s19 }
  0x1b   : > { %165 = vrot.lane.b32.xlu1 %v139_v3, %s429_s16  ;;  %161 = vrot.lane.b32.xlu0 %v137_v4, %s429_s16  ;;  %v156_v31 = vsub.f32 %v137_v4, %v147_v23  ;;  %v178_v33 = vmul.f32 %v157_v26, %v157_v26  ;;  %v176_v34 = vmul.f32 %v155_v29, %v155_v29  ;;  %s360_s21 = scalar_lea.vmem %s257_s19, 16  ;;  %s366_s22 = scalar_lea.vmem %s257_s19, 32 }
  0x1c   : > { %v179_v36 = vmul.f32 %v158_v30, %v158_v30  ;;  %p361_p6 = scmp.ne.s32.totalorder %s257_s19, %s360_s21  ;;  %p367_p9 = scmp.lt.s32.totalorder %s257_s19, %s257_s19 }
  0x1d   : > { %v177_v35 = vmul.f32 %v156_v31, %v156_v31  ;;  %v181_v37 = vsel %vm180_vm3, %v176_v34, 0.0  ;;  %v182_v38 = vsel %vm180_vm3, %v178_v33, 0.0  ;;  %p368_p10 = scmp.lt.s32.totalorder %s366_s22, %s360_s21 }
  0x1e   : > { %v186_v40 = vsel %vm184_vm4, %v179_v36, 0.0  ;;  %v183_v41 = vadd.f32 %v182_v38, %v181_v37  ;;  %p362_p7 = pnand %p361_p6, %p343_p5 }
  0x1f   : > { %v185_v39 = vsel %vm184_vm4, %v177_v35, 0.0  ;;  %p369_p11 = por %p368_p10, %p367_p9 }
  0x20   : > { %v187_v42 = vadd.f32 %v186_v40, %v185_v39  ;;  %v191_v43 = vrot.slane %v183_v41, 1  ;;  %p363_p8 = pneg %p362_p7 }
  0x22   : > { %v192_v44 = vrot.slane %v187_v42, 1  ;;  %p370_p12 = pnand %p369_p11, %p363_p8 }
  0x24   : > { %v193_v45 = vsel %vm190_vm5, %v191_v43, %v192_v44  ;;  %v198_v47 = vsel %vm197_vm6, %v192_v44, 0.0 }
  0x25   : > { %v196_v46 = vsel %vm184_vm4, %v193_v45, 0.0 }
  0x26   : > { %v199_v48 = vadd.f32 %v198_v47, %v196_v46 }
  0x89   : > { %v164_v5 = vpop.permute.xlu1 %163  ;;  %v160_v6 = vpop.permute.xlu0 %159 }
  0x8a   : > { %v173_v7 = vsub.f32 %v138_v1, %v164_v5  ;;  %v171_v8 = vsub.f32 %v136_v2, %v160_v6 }
  0x8c   : > { %v216_v13 = vmul.f32 %v173_v7, %v173_v7  ;;  %v214_v14 = vmul.f32 %v171_v8, %v171_v8 }
  0x8d   : > { %v166_v15 = vpop.permute.xlu1 %165  ;;  %v162_v16 = vpop.permute.xlu0 %161 }
  0x8e   : > { %v220_v17 = vsel %vm218_vm1, %v216_v13, 0.0  ;;  %v219_v18 = vsel %vm218_vm1, %v214_v14, 0.0  ;;  %v174_v19 = vsub.f32 %v139_v3, %v166_v15  ;;  %v172_v20 = vsub.f32 %v137_v4, %v162_v16 }
  0x8f   : > { %v221_v21 = vadd.f32 %v220_v17, %v219_v18 }
  0x90   : > { %v217_v24 = vmul.f32 %v174_v19, %v174_v19  ;;  %v215_v25 = vmul.f32 %v172_v20, %v172_v20 }
  0x91   : > { %227 = vrot.lane.b32.xlu0 %v221_v21, %s430_s17 }
  0x92   : > { %v223_v27 = vsel %vm218_vm1, %v217_v24, 0.0  ;;  %v222_v28 = vsel %vm218_vm1, %v215_v25, 0.0 }
  0x93   : > { %v224_v32 = vadd.f32 %v223_v27, %v222_v28 }
  0x95   : > { %229 = vrot.lane.b32.xlu1 %v224_v32, %s430_s17 }
  0xb0   : > { %200 = vadd.xlane.f32.xlu0 %v199_v48 }
 0x103   : > { %v228_v49 = vpop.permute.xlu0 %227 }
 0x104   : > { %v234_v51 = vsel %vm233_vm7, %v228_v49, 0.0 }
 0x107   : > { %v230_v50 = vpop.permute.xlu1 %229 }
 0x108   : > { %v235_v52 = vsel %vm233_vm7, %v230_v50, 0.0 }
 0x109   : > { %v236_v53 = vadd.f32 %v235_v52, %v234_v51 }
 0x10b   : > { %237 = vadd.xlane.f32.xlu1 %v236_v53 }
 0x13d   : > { %v201_v54 = vpop.xlane.xlu0 %200 }
 0x13e   : > { %v202_v55 = vrot.slane %v201_v54, 4 }
 0x140   : > { %v203_v56 = vadd.f32 %v202_v55, %v201_v54 }
 0x142   : > { %v204_v57 = vrot.slane %v203_v56, 2 }
 0x144   : > { %v205_v58 = vadd.f32 %v204_v57, %v203_v56 }
 0x146   : > { %v206_v59 = vrot.slane %v205_v58, 1 }
 0x148   : > { %v207_v60 = vadd.f32 %v206_v59, %v205_v58 }
 0x14a   : > { %331 = vpush %v207_v60 }
 0x17b   : > { %s332_s20 = spop %331 }
 0x17c   : > { %v209_v62 = vstv %s332_s20 }
 0x17d   : > { %v210_v63 = vadd.f32 %v209_v62, %v175_v61 }
 0x17f   : > { %212 = vst.msk [vmem:[#allocation2] sm:$0x1] %vm211_vm8, %v210_v63 }
 0x180   : > { %373 = shalt.err (!%p370_p12)
}
 0x181   : > { %s374_s25 = scalar_lea.hbm %s519_s1, 16 }
 0x182   : > { %p375_p13 = scmp.ne.s32.totalorder %s519_s1, %s374_s25  ;;  %p380_p2 = scmp.lt.u32.totalorder %s374_s25, %s519_s1 }
 0x184   : > { %p376_p0 = pnand %p375_p13, %p343_p5 }
 0x186   : > { %p377_p1 = pneg %p376_p0 }
 0x188   : > { %p382_p3 = pnand %p380_p2, %p377_p1 }
 0x18a   : > { %385 = shalt.err (!%p382_p3)
}
 0x18b   : > { %336 = dma.vmem_to_hbm [thread:$0]  (%p343_p5), %s257_s19, 16, %s519_s1, [#allocation3]   ;;  %v213_v7 = vld [vmem:[#allocation4] sm:$0x1] }
 0x18c   : > { %s432_s4 = smov [#allocation4]  }
 0x18d   : > { %s267_s5 = sshll.u32 %s432_s4, 4  ;;  %s268_s5 = int_to_ptr.vmem [resolvable:$true] %s267_s5 }
 0x18e   : > { %s386_s7 = scalar_lea.vmem %s268_s5, 16  ;;  %s392_s8 = scalar_lea.vmem %s268_s5, 32 }
 0x18f   : > { %p387_p4 = scmp.ne.s32.totalorder %s268_s5, %s386_s7  ;;  %p393_p8 = scmp.lt.s32.totalorder %s268_s5, %s268_s5 }
 0x190   : > { %p394_p9 = scmp.lt.s32.totalorder %s392_s8, %s386_s7 }
 0x191   : > { %p388_p6 = pnand %p387_p4, %p343_p5 }
 0x192   : > { %p395_p10 = por %p394_p9, %p393_p8 }
 0x193   : > { %p389_p7 = pneg %p388_p6 }
 0x195   : > { %p396_p11 = pnand %p395_p10, %p389_p7 }
 0x198   : > { %v238_v0 = vpop.xlane.xlu1 %237 }
 0x199   : > { %v239_v1 = vrot.slane %v238_v0, 4 }
 0x19b   : > { %v240_v2 = vadd.f32 %v239_v1, %v238_v0 }
 0x19d   : > { %v241_v3 = vrot.slane %v240_v2, 2 }
 0x19f   : > { %v242_v4 = vadd.f32 %v241_v3, %v240_v2 }
 0x1a1   : > { %v243_v5 = vrot.slane %v242_v4, 1 }
 0x1a3   : > { %v244_v6 = vadd.f32 %v243_v5, %v242_v4 }
 0x1a5   : > { %333 = vpush %v244_v6 }
 0x1d6   : > { %s334_s6 = spop %333 }
 0x1d7   : > { %v246_v8 = vstv %s334_s6 }
 0x1d8   : > { %v247_v9 = vadd.f32 %v246_v8, %v213_v7 }
 0x1da   : > { %248 = vst.msk [vmem:[#allocation4] sm:$0x1] %vm211_vm8, %v247_v9 }
 0x1db   : > { %399 = shalt.err (!%p396_p11)
}
 0x1dc   : > { %s400_s13 = scalar_lea.hbm %s520_s2, 16 }
 0x1dd   : > { %p401_p12 = scmp.ne.s32.totalorder %s520_s2, %s400_s13  ;;  %p406_p1 = scmp.lt.u32.totalorder %s400_s13, %s520_s2 }
 0x1df   : > { %p402_p13 = pnand %p401_p12, %p343_p5 }
 0x1e1   : > { %p403_p0 = pneg %p402_p13 }
 0x1e3   : > { %p408_p2 = pnand %p406_p1, %p403_p0 }
 0x1e5   : > { %411 = shalt.err (!%p408_p2)
}
 0x1e6   : > { %338 = dma.vmem_to_hbm [thread:$0]  (%p343_p5), %s268_s5, 16, %s520_s2, [#allocation5]  }
 0x1e7   : > { %417 = dma.done.wait (%p343_p5), [#allocation3], 16  }
 0x1e8   : > { %419 = vsyncadd (%p343_p5), [#allocation3], 4294967280 }
 0x1e9   : > { %421 = dma.done.wait (%p343_p5), [#allocation5], 16  }
 0x1ea   : > { %423 = vsyncadd (%p343_p5), [#allocation5], 4294967280 }
 0x1eb PF: > { %s15_s9 = sadd.s32 1, %s426_s9  }
 0x1ec   : > { %p12_p3 = scmp.ge.s32.totalorder %s15_s9, 4  }
 0x1ee   :  { %14 = sbr.rel (!%p12_p3) target bundleno = 2 (0x2), region = 63 }
 0x1f5   :  { %284 = vsyncpa [#allocation3], 1 }
 0x1f6   :  { %286 = vsyncpa [#allocation3 + $0x1], 1 }
 0x1f7   :  { %287 = vsyncpa [#allocation5], 1 }

</bundles_post_ra>
